<compile_context>
chip_gen: v6e
topology: v6e:2x2x1
jax: 0.10.0
libtpu: 0.0.40
codegen_flags: <defaults>
</compile_context>

<pallas_src>
import math
import jax
import jax.numpy as jnp
from jax.experimental import pallas as pl
from jax.experimental.pallas import tpu as pltpu


def _to_2tuple(x):
    if isinstance(x, (tuple, list)):
        return tuple(x)
    return (x, x)


def _round_up(x, m):
    return ((x + m - 1) // m) * m


# ----------------------------- Pallas kernel ------------------------------ #
def _proj_kernel(p_ref, w_ref, b_ref, o_ref):
    # p_ref: (tm, K)  bf16  im2col patch tile (full, unpadded K resident)
    # w_ref: (K, Np)  bf16  full projection weight (constant block -> 1 fetch)
    # b_ref: (1, Np)  f32   bias (constant block -> 1 fetch)
    # o_ref: (tm, Np) f32/bf16
    acc = jnp.dot(p_ref[...], w_ref[...], preferred_element_type=jnp.float32)
    o_ref[...] = (acc + b_ref[...]).astype(o_ref.dtype)


def _proj_pallas(patches, w, b, *, tm, out_dtype=jnp.float32, vmem_limit):
    """out[M, Np] = patches[M, K] @ w[K, Np] + b[1, Np].

    1-D grid over M: weight/bias blocks have a constant index so Pallas DMAs
    them once and keeps them in VMEM; the last M block may be ragged (partial
    store is masked; padded rows never mix into valid rows).
    """
    M, K = patches.shape
    K2, Np = w.shape
    assert K == K2 and b.shape == (1, Np)

    grid_m = pl.cdiv(M, tm)
    cost = pl.CostEstimate(
        flops=2 * M * Np * K,
        transcendentals=0,
        bytes_accessed=(patches.size * patches.dtype.itemsize
                        + w.size * w.dtype.itemsize
                        + b.size * b.dtype.itemsize
                        + M * Np * jnp.dtype(out_dtype).itemsize),
    )
    return pl.pallas_call(
        _proj_kernel,
        out_shape=jax.ShapeDtypeStruct((M, Np), out_dtype),
        grid_spec=pl.GridSpec(
            grid=(grid_m,),
            in_specs=[
                pl.BlockSpec((tm, K), lambda i: (i, 0)),    # stream M tiles
                pl.BlockSpec((K, Np), lambda i: (0, 0)),    # weight resident
                pl.BlockSpec((1, Np), lambda i: (0, 0)),    # bias resident
            ],
            out_specs=pl.BlockSpec((tm, Np), lambda i: (i, 0)),
        ),
        compiler_params=pltpu.CompilerParams(
            dimension_semantics=("parallel",),
            vmem_limit_bytes=vmem_limit,
        ),
        cost_estimate=cost,
    )(patches, w, b)


# ------------------------------ Module port ------------------------------- #
class PatchEmbedOverlap:
    """JAX/Pallas port of PatchEmbed_overlap."""

    _LANE = 128  # vreg lane width

    def __init__(self, img_size=16, patch_size=6, stride_size=5,
                 in_chans=4, embed_dim=32, key=None,
                 compute_dtype=jnp.bfloat16, out_dtype=jnp.float32):
        img_size = _to_2tuple(img_size)
        patch_size = _to_2tuple(patch_size)
        stride_size = _to_2tuple(stride_size)
        self.img_size = img_size
        self.patch_size = patch_size
        self.stride_size = stride_size
        self.in_chans = in_chans
        self.embed_dim = embed_dim
        self.compute_dtype = compute_dtype
        self.out_dtype = out_dtype
        self.num_x = (img_size[1] - patch_size[1]) // stride_size[1] + 1
        self.num_y = (img_size[0] - patch_size[0]) // stride_size[0] + 1
        self.num_patches = self.num_x * self.num_y

        if key is None:
            key = jax.random.PRNGKey(0)
        k_w, k_b = jax.random.split(key)

        # Matches the torch init: weight ~ N(0, sqrt(2 / (kh*kw*out_ch)))
        n = patch_size[0] * patch_size[1] * embed_dim
        std = math.sqrt(2.0 / n)
        # torch conv weight layout: (embed_dim, in_chans, ph, pw)
        self.weight = std * jax.random.normal(
            k_w, (embed_dim, in_chans, patch_size[0], patch_size[1]),
            dtype=jnp.float32)
        # torch Conv2d default bias: U(-1/sqrt(fan_in), 1/sqrt(fan_in))
        fan_in = in_chans * patch_size[0] * patch_size[1]
        bound = 1.0 / math.sqrt(fan_in)
        self.bias = jax.random.uniform(
            k_b, (embed_dim,), dtype=jnp.float32, minval=-bound, maxval=bound)

        # ---- hoisted kernel operands (computed once) ----
        K = in_chans * patch_size[0] * patch_size[1]
        self._K = K                                   # no K padding
        self._Np = _round_up(embed_dim, self._LANE)   # lane-dense out / weight cols
        # (E, C, ph, pw) -> (K, E); zero-pad N only; cast for the MXU.
        w2d = self.weight.reshape(embed_dim, K).T
        self._w2d = jnp.pad(
            w2d, ((0, 0), (0, self._Np - embed_dim))).astype(compute_dtype)
        # Bias kept in f32 (added to the f32 accumulator in-kernel).
        self._b2d = jnp.pad(self.bias.reshape(1, embed_dim),
                            ((0, 0), (0, self._Np - embed_dim))).astype(jnp.float32)

        self._forward = jax.jit(self._forward_impl)

    # --- tile selection -------------------------------------------------- #
    def _working_set_bytes(self, tm):
        cd = jnp.dtype(self.compute_dtype).itemsize
        od = jnp.dtype(self.out_dtype).itemsize
        return (2 * (tm * self._K * cd + tm * self._Np * od)       # dbl-buffered
                + 2 * (self._K * self._Np * cd + self._Np * 4))     # resident w/b

    def _pick_tm(self, M):
        # Big tiles amortize per-grid-step overhead (~0.35 us), but keep >= 2
        # M blocks when possible so both v7x TensorCores get work.
        tm = min(1024, max(16, _round_up(max(1, (M + 1) // 2), 16)))
        # Stay comfortably inside v7x's 64 MiB VMEM/TC.
        while tm > 16 and self._working_set_bytes(tm) > 40 * 1024 * 1024:
            tm //= 2
        return tm

    # --- forward ---------------------------------------------------------- #
    def _forward_impl(self, x):
        B, C, H, W = x.shape
        ph, pw = self.patch_size
        sh, sw = self.stride_size
        K, Np = self._K, self._Np

        # im2col, features-last: (B, num_y, num_x, K) with K ordered (c, ph, pw),
        # matching the (E, C, ph, pw) -> (K, E) weight flatten. Patch order
        # (y-major, then x) matches torch's proj(x).flatten(2).transpose(1, 2).
        # No transpose, no K/M padding; the reshape + bf16 cast fuse with the
        # patch producer under jit.
        # TODO(synk): for large images, do the im2col gather inside the kernel
        # (x with memory_space=pl.ANY + manual double-buffered row-stripe DMA)
        # to avoid materializing the (ph*pw)/(sh*sw)-inflated im2col matrix in HBM.
        patches = jax.lax.conv_general_dilated_patches(
            x, filter_shape=(ph, pw), window_strides=(sh, sw),
            padding="VALID",
            dimension_numbers=("NCHW", "OIHW", "NHWC"))
        M = B * self.num_patches
        patches2d = patches.reshape(M, K).astype(self.compute_dtype)

        tm = self._pick_tm(M)
        vmem_limit = int(min(48 * 1024 * 1024,
                             max(32 * 1024 * 1024,
                                 2 * self._working_set_bytes(tm))))

        out2d = _proj_pallas(patches2d, self._w2d, self._b2d,
                             tm=tm, out_dtype=self.out_dtype,
                             vmem_limit=vmem_limit)
        if Np != self.embed_dim:
            out2d = out2d[:, :self.embed_dim]
        return out2d.reshape(B, self.num_patches, self.embed_dim)

    def __call__(self, x):
        B, C, H, W = x.shape
        assert H == self.img_size[0] and W == self.img_size[1], (
            f"Input image size ({H}*{W}) doesn't match model "
            f"({self.img_size[0]}*{self.img_size[1]}).")
        return self._forward(x)


# --------------------------------- main ------------------------------------ #
if __name__ == "__main__":
    key = jax.random.PRNGKey(0)
    k_x, k_p = jax.random.split(key)

    B, C, H, W = 2, 4, 16, 16
    module = PatchEmbedOverlap(img_size=16, patch_size=6, stride_size=5,
                               in_chans=C, embed_dim=32, key=k_p)
    x = jax.random.normal(k_x, (B, C, H, W), dtype=jnp.float32)

    out = module(x)
    out = jax.block_until_ready(out)

    # Reference check in plain JAX (f32 conv via lax) to validate semantics,
    # including the (c, ph, pw) feature ordering of the features-last im2col.
    ref = jax.lax.conv_general_dilated(
        x, module.weight, window_strides=module.stride_size, padding="VALID",
        dimension_numbers=("NCHW", "OIHW", "NCHW"))
    ref = ref + module.bias[None, :, None, None]
    ref = ref.reshape(B, module.embed_dim, -1).transpose(0, 2, 1)
    assert out.shape == (B, module.num_patches, module.embed_dim), out.shape
    # bf16 MXU inputs (f32 accumulate) -> loosened tolerance vs. the f32 ref.
    assert jnp.allclose(out, ref, atol=3e-2, rtol=3e-2), (
        float(jnp.max(jnp.abs(out - ref))))

    print("KERNEL_OK")
</pallas_src>

<mosaic_0001>
module attributes {stable_mosaic.version = 11 : i64} {
  func.func @_proj_kernel(%arg0: i32, %arg1: memref<16x144xbf16, #tpu.memory_space<vmem>>, %arg2: memref<144x128xbf16, #tpu.memory_space<vmem>>, %arg3: memref<1x128xf32, #tpu.memory_space<vmem>>, %arg4: memref<16x128xf32, #tpu.memory_space<vmem>>) attributes {dimension_semantics = [#tpu.dimension_semantics<parallel>], iteration_bounds = array<i64: 2>, scalar_prefetch = 0 : i64, scratch_operands = 0 : i64, tpu.core_type = #tpu.core_type<tc>, window_params = [{transform_indices = @transform_0, window_bounds = array<i64: 16, 144>}, {pipeline_mode = #tpu.pipeline_mode<synchronous>, transform_indices = @transform_1, window_bounds = array<i64: 144, 128>}, {pipeline_mode = #tpu.pipeline_mode<synchronous>, transform_indices = @transform_2, window_bounds = array<i64: 1, 128>}, {transform_indices = @transform_3, window_bounds = array<i64: 16, 128>}]} {
    %c0 = arith.constant 0 : index
    %c0_0 = arith.constant 0 : index
    %0 = vector.load %arg1[%c0, %c0_0] : memref<16x144xbf16, #tpu.memory_space<vmem>>, vector<16x144xbf16>
    %c0_1 = arith.constant 0 : index
    %c0_2 = arith.constant 0 : index
    %1 = vector.load %arg2[%c0_1, %c0_2] : memref<144x128xbf16, #tpu.memory_space<vmem>>, vector<144x128xbf16>
    %cst = arith.constant dense<0.000000e+00> : vector<16x128xf32>
    %2 = tpu.matmul %0, %1, %cst {dimension_numbers = #tpu.dot_dimension_numbers<[1], [0], [0], [1], [0, 0, 1, 1], [], []>} : vector<16x144xbf16>, vector<144x128xbf16>, vector<16x128xf32> -> vector<16x128xf32>
    %c0_3 = arith.constant 0 : index
    %c0_4 = arith.constant 0 : index
    %3 = vector.load %arg3[%c0_3, %c0_4] : memref<1x128xf32, #tpu.memory_space<vmem>>, vector<1x128xf32>
    %4 = vector.broadcast %3 : vector<1x128xf32> to vector<16x128xf32>
    %5 = arith.addf %2, %4 : vector<16x128xf32>
    %c0_5 = arith.constant 0 : index
    %c0_6 = arith.constant 0 : index
    %6 = vector.load %arg4[%c0_5, %c0_6] : memref<16x128xf32, #tpu.memory_space<vmem>>, vector<16x128xf32>
    tpu.vector_store %arg4[%c0_5, %c0_6], %5 {strides = array<i32>} : memref<16x128xf32, #tpu.memory_space<vmem>>, vector<16x128xf32>,
    return
  }
  func.func @transform_0(%arg0: i32) -> (i32, i32) {
    %c0_i32 = arith.constant 0 : i32
    %c0_i32_0 = arith.constant 0 : i32
    return %arg0, %c0_i32 : i32, i32
  }
  func.func @transform_1(%arg0: i32) -> (i32, i32) {
    %c0_i32 = arith.constant 0 : i32
    %c0_i32_0 = arith.constant 0 : i32
    %c0_i32_1 = arith.constant 0 : i32
    return %c0_i32, %c0_i32_0 : i32, i32
  }
  func.func @transform_2(%arg0: i32) -> (i32, i32) {
    %c0_i32 = arith.constant 0 : i32
    %c0_i32_0 = arith.constant 0 : i32
    %c0_i32_1 = arith.constant 0 : i32
    return %c0_i32, %c0_i32_0 : i32, i32
  }
  func.func @transform_3(%arg0: i32) -> (i32, i32) {
    %c0_i32 = arith.constant 0 : i32
    %c0_i32_0 = arith.constant 0 : i32
    return %arg0, %c0_i32 : i32, i32
  }
}

</mosaic_0001>

<bundles_post_ra>
// kernel: _forward_impl.1
= control target key start
LH: loop header
LB: loop body
LE: loop exit
PB: predicated region body
PF: predicated region fallthrough
CT: control target
= control target key end

     0   :  { %s810_s12 = smov 0   ;;  %s812_s13 = smov 0   ;;  %s923_s0 = inlined_call_operand.vmem [shape: bf16[18,144], index: 0, kind: input, shape index: {}]   ;;  %s924_s1 = inlined_call_operand.vmem [shape: bf16[144,128], index: 1, kind: input, shape index: {}]   ;;  %s925_s2 = inlined_call_operand.vmem [shape: f32[1,128], index: 2, kind: input, shape index: {}]   ;;  %s926_s3 = inlined_call_operand.vmem [shape: f32[18,128], index: 3, kind: output, shape index: {}]  }
   0x1   :  { %s814_s14 = smov 0  }
   0x2 LB: > { %s823_s15 = sadd.s32 4294967295, %s755_s14   ;;  %s825_s16 = sadd.s32 1, %s755_s14   ;;  %s755_s14 = sphi %s814_s14, %s930_s14   ;;  %s751_s13 = sphi %s812_s13, %s929_s13   ;;  %s747_s12 = sphi %s810_s12, %s928_s12  }
   0x3   : > { %s85_s17 = ssub.s32 %s755_s14, %s825_s16  ;;  %s88_s18 = sadd.s32 1, %s751_s13 }
   0x4   : > { %p86_p0 = scmp.eq.s32.totalorder %s85_s17, 0  ;;  %p98_p1 = scmp.ne.s32.totalorder %s751_s13, %s747_s12 }
   0x5   : > { %p99_p2 = scmp.eq.s32.totalorder %s823_s15, 1  ;;  %p561_p3 = scmp.ge.s32.totalorder %s755_s14, 1 }
   0x6   : > { %s833_s19 = scalar_select %p86_p0, %s751_s13, %s88_s18  }
   0x7   : > { %p835_p4 = por %p99_p2, %p98_p1  ;;  %p149_p5 = scmp.lt.s32.totalorder %s755_s14, 3 }
   0x9   : > { %p150_p6 = pnand %p561_p3, %p149_p5 }
   0xa   : > { %s843_s23 = sshll.u32 (!%p150_p6), %s823_s15, 1  ;;  %s175_s25 = sand.u32 (!%p150_p6), 1, %s747_s12  }
   0xb   : > { %153 = sbr.rel (%p150_p6) target bundleno = 292 (0x124), region = 32  ;;  %p184_p7 = scmp.lt.s32.totalorder (!%p150_p6), %s843_s23, 2 }
  0x10   : > { %v689_v0 = vld [vmem:[%s924_s1 + $0x38] sm:$0xff]   ;;  %v789_v1 = vmov 0   ;;  %v690_v2 = vld [vmem:[%s924_s1 + $0x30] sm:$0xff]   ;;  %s185_s26 = scalar_select %p184_p7, %s843_s23, 2  ;;  %v691_v3 = vld [vmem:[%s924_s1 + $0x28] sm:$0xff]   ;;  %vm291_vm0 = vcmask 130048  }
  0x11   : > { %295 = vmatprep.subr.bf16.mxu0 %v789_v1  ;;  %v692_v4 = vld [vmem:[%s924_s1 + $0x20] sm:$0xff]   ;;  %v693_v6 = vld [vmem:[%s924_s1 + $0x18] sm:$0xff]   ;;  %v694_v7 = vld [vmem:[%s924_s1 + $0x10] sm:$0xff]   ;;  %s346_s12 = ssub.s32 (%p835_p4), 3, %s843_s23  ;;  %s597_s30 = sshll.u32 (%p835_p4), %s823_s15, 4 }
  0x12   : > { %296 = vmatpush1.bf16.msra.mxu0 %v689_v0  ;;  %s596_s29 = sshll.u32 %s185_s26, 3  ;;  %v695_v8 = vld [vmem:[%s924_s1 + $0x8] sm:$0xff]   ;;  %v696_v9 = vld [vmem:[%s924_s1] sm:$0xff]   ;;  %s562_s26 = sshll.u32 %s175_s25, 4 }
  0x13   : > { %297 = vmatprep.subr.bf16.mxu0 %v789_v1  ;;  %s188_s5 = scalar_lea.vmem %s923_s0, %s596_s29  ;;  %v697_v10 = vld [vmem:[%s924_s1 + $0x40] sm:$0xff]   ;;  %s878_s29 = scalar_lea.vmem [#allocation2], %s562_s26  }
  0x14   : > { %v700_v5 = vld [vmem:[%s188_s5 + $0x4] ss:$8 sps:$4 sm:$0xff]   ;;  %v698_v11 = vld [vmem:[%s188_s5] ss:$8 sps:$4 sm:$0xff]   ;;  %p347_p8 = scmp.lt.s32.totalorder (%p835_p4), %s346_s12, 2  ;;  %s889_s6 = scalar_lea.vmem (%p835_p4), %s926_s3, %s597_s30  }
  0x15   : > { %578 = vmatprep.mubr.msk.bf16.mxu0 %vm291_vm0, %v700_v5  ;;  %v566_v12 = vld [vmem:[%s925_s2] ss:$0 sm:$0xff] }
  0x16   : > { %298 = vmatpush1.bf16.msra.mxu0 %v690_v2 }
  0x17   : > { %299 = vmatprep.subr.bf16.mxu0 %v789_v1 }
  0x1a   : > { %300 = vmatpush1.bf16.msra.mxu0 %v691_v3 }
  0x1b   : > { %301 = vmatprep.subr.bf16.mxu0 %v789_v1 }
  0x1e   : > { %302 = vmatpush1.bf16.msra.mxu0 %v692_v4 }
  0x1f   : > { %303 = vmatprep.subr.bf16.mxu0 %v789_v1 }
  0x22   : > { %304 = vmatpush1.bf16.msra.mxu0 %v693_v6 }
  0x23   : > { %305 = vmatprep.subr.bf16.mxu0 %v789_v1 }
  0x26   : > { %306 = vmatpush1.bf16.msra.mxu0 %v694_v7 }
  0x27   : > { %307 = vmatprep.subr.bf16.mxu0 %v789_v1 }
  0x2a   : > { %308 = vmatpush1.bf16.msra.mxu0 %v695_v8 }
  0x2b   : > { %309 = vmatprep.subr.bf16.mxu0 %v789_v1 }
  0x2e   : > { %310 = vmatpush1.bf16.msra.mxu0 %v696_v9 }
  0x2f   : > { %325 = vmatprep.subr.bf16.mxu0 %v789_v1 }
  0x32   : > { %326 = vmatpush2.bf16.msra.mxu0 %v697_v10 }
  0x35   : > { %328 = vmatmul.mubr.bf16.vlgmr.msra.gmra.mxu0 %v698_v11 }
  0xf5   : > { %v329_v13 = vpop.f32.mrf.mxu0 }
  0xf6   : > { %v330_v14 = vadd.f32 %v566_v12, %v329_v13 }
  0xf7   : > { %v331_v15 = vpop.f32.mrf.mxu0 }
  0xf8   : > { %336 = vst [vmem:[%s878_s29] sm:$0xff] %v330_v14  ;;  %344 = sbr.rel (!%p835_p4) target bundleno = 292 (0x124), region = 36 }
  0xf9   : > { %v332_v16 = vpop.f32.mrf.mxu0 }
  0xfa   : > { %v333_v17 = vadd.f32 %v566_v12, %v332_v16 }
  0xfb   : > { %v334_v18 = vpop.f32.mrf.mxu0 }
  0xfc   : > { %337 = vst [vmem:[%s878_s29 + $0x8] sm:$0xff] %v333_v17 }
  0xfd   : > { %s932_s12 = smov (!%p347_p8, %s346_s12), 2 }
  0xfe   : > { %s581_s7 = sshll.u32 %s932_s12, 7 }
  0xff   : > { %p584_p9 = scmp.eq.s32.totalorder %s581_s7, 0 }
 0x100   : > { %s895_s8 = sshrl.u32 (!%p584_p9), %s932_s12, 1 }
 0x101   : > { %355 = sbr.rel (%p584_p9) target bundleno = 292 (0x124), region = 40  ;;  %p585_p10 = scmp.le.s32.totalorder (!%p584_p9), %s895_s8, 0 }
 0x106   : > { %514 = sbr.rel (%p585_p10) target bundleno = 275 (0x113), region = 116  ;;  %s757_s15 = smov (!%p585_p10), %s889_s6  }
 0x107   : > { %s761_s20 = smov (!%p585_p10), %s878_s29   ;;  %s765_s23 = smov (!%p585_p10), 0  }
 0x108   : > { %s769_s9 = smov (!%p585_p10), 0  }
 0x10b LB: >> { %v420_v19 = vld [vmem:[%s763_s20] sm:$0xff]  ;;  %v422_v20 = vld [vmem:[%s763_s20 + $0x8] sm:$0xff]  ;;  %s424_s10 = sadd.s32 1, %s767_s23  ;;  %s414_s9 = sadd.s32 1, %s771_s9   ;;  %s771_s9 = sphi %s769_s9, %s414_s9   ;;  %s767_s23 = sphi %s765_s23, %s766_s23   ;;  %s763_s20 = sphi %s761_s20, %s429_s20   ;;  %s759_s15 = sphi %s757_s15, %s430_s15  }
 0x10c   : >> { %421 = vst [vmem:[%s759_s15] sm:$0xff] %v420_v19  ;;  %423 = vst [vmem:[%s759_s15 + $0x8] sm:$0xff] %v422_v20  ;;  %p425_p11 = scmp.ge.s32.totalorder %s424_s10, %s895_s8  ;;  %p413_p12 = scmp.ge.s32.totalorder %s414_s9, %s895_s8 }
 0x10e   : >> { %s934_s10 = smov (%p425_p11, %s424_s10), 0  ;;  %416 = sbr.rel (!%p413_p12) target bundleno = 267 (0x10b), region = 122 }
 0x10f   : >> { %s586_s11 = sshll.u32 %s934_s10, 4  ;;  %s766_s23 = smov %s934_s10  }
 0x110   : >> { %s429_s20 = scalar_lea.vmem %s878_s29, %s586_s11 [#allocation2]   ;;  %s430_s15 = scalar_lea.vmem %s889_s6, %s586_s11  }
 0x113 PF: > { %s905_s14 = sand.u32 1, %s932_s12   ;;  %s598_s17 = sshll.u32 %s895_s8, 4 }
 0x114   : > { %s435_s18 = scalar_lea.vmem %s878_s29, %s598_s17 [#allocation2]   ;;  %s437_s21 = scalar_lea.vmem %s889_s6, %s598_s17  }
 0x115   : > { %p591_p13 = scmp.le.s32.totalorder %s905_s14, 0 }
 0x116   : > { %s773_s22 = smov (!%p591_p13), %s437_s21   ;;  %s777_s24 = smov (!%p591_p13), %s435_s18  }
 0x117   : > { %528 = sbr.rel (%p591_p13) target bundleno = 292 (0x124), region = 127  ;;  %s781_s25 = smov (!%p591_p13), 0  }
 0x118   : > { %s785_s26 = smov (!%p591_p13), 0  }
 0x11c LB: >> { %v447_v21 = vld [vmem:[%s779_s24] sm:$0xff]  ;;  %s449_s27 = sadd.s32 1, %s783_s25  ;;  %s441_s26 = sadd.s32 1, %s787_s26   ;;  %s787_s26 = sphi %s785_s26, %s441_s26   ;;  %s783_s25 = sphi %s781_s25, %s782_s25   ;;  %s779_s24 = sphi %s777_s24, %s454_s24   ;;  %s775_s22 = sphi %s773_s22, %s455_s22  }
 0x11d   : >> { %448 = vst [vmem:[%s775_s22] sm:$0xff] %v447_v21  ;;  %p450_p0 = scmp.ge.s32.totalorder %s449_s27, %s905_s14  ;;  %p440_p1 = scmp.ge.s32.totalorder %s441_s26, %s905_s14 }
 0x11f   : >> { %s936_s27 = smov (%p450_p0, %s449_s27), 0  ;;  %443 = sbr.rel (!%p440_p1) target bundleno = 284 (0x11c), region = 133 }
 0x120   : >> { %s592_s28 = sshll.u32 %s936_s27, 3  ;;  %s782_s25 = smov %s936_s27  }
 0x121   : >> { %s454_s24 = scalar_lea.vmem %s435_s18, %s592_s28 [#allocation2]   ;;  %s455_s22 = scalar_lea.vmem %s437_s21, %s592_s28  }
 0x124 PF: > { %p10_p2 = scmp.ge.s32.totalorder %s825_s16, 4   ;;  %s928_s12 = smov %s751_s13 }
 0x125   : > { %s929_s13 = smov %s833_s19  ;;  %s930_s14 = smov %s825_s16 }
 0x126   :  { %12 = sbr.rel (!%p10_p2) target bundleno = 2 (0x2), region = 144 }

</bundles_post_ra>
